<compile_context>
chip_gen: v7x
topology: tpu7x:2x2x1
jax: 0.10.0
libtpu: 0.0.40
codegen_flags: <defaults>
</compile_context>

<pallas_src>
import functools

import jax
import jax.numpy as jnp
from jax.experimental import pallas as pl
from jax.experimental.pallas import tpu as pltpu


def _round_up(x, m):
    return (x + m - 1) // m * m


def _pick_tile(n_pad, target, granularity=128):
    """Largest multiple of `granularity` <= target that divides n_pad."""
    t = min(target, n_pad)
    t = max(granularity, (t // granularity) * granularity)
    while n_pad % t != 0:
        t -= granularity
    return t


def _select_tiling(n_pad):
    """Per-generation tile sizes + VMEM cap for the memory-bound A_hat stream."""
    try:
        info = pltpu.get_tpu_info()
        vmem_cap = int(getattr(info, "vmem_capacity_bytes", 64 << 20))
    except Exception:
        vmem_cap = 64 << 20                      # conservative (v7x-sized)

    if vmem_cap >= (100 << 20):                  # v5e / v6e: 128 MiB physical
        vmem_limit = 100 << 20
        tm_target, tk_target = 1024, 4096        # A tile = 8 MiB (x2 buffers)
    else:                                        # v7x: 64 MiB physical
        vmem_limit = 48 << 20
        tm_target, tk_target = 1024, 2048        # A tile = 4 MiB (x2 buffers)

    tk = _pick_tile(n_pad, tk_target)
    # Keep >= 2 row tiles so the "parallel" axis can shard across 2 TCs (v7x).
    tm_cap = n_pad // 2 if n_pad >= 512 else n_pad
    tm = _pick_tile(n_pad, min(tm_target, tm_cap))
    return tm, tk, vmem_limit


def _agg_kernel(a_ref, z_ref, b_ref, *rest, fuse_w2, z_resident, tk):
    """One K-step of  out = A_hat @ Z + bias.

    If fuse_w2: epilogue emits  relu(A_hat @ Z + b1) @ W2  (GraphConv-1 agg
    fused with GraphConv-2's feature transform); otherwise plain bias add
    (GraphConv-2 aggregation)."""
    if fuse_w2:
        w2_ref, o_ref, acc_ref = rest
    else:
        o_ref, acc_ref = rest

    k = pl.program_id(1)

    @pl.when(k == 0)
    def _():
        acc_ref[...] = jnp.zeros_like(acc_ref)

    if z_resident:
        start = pl.multiple_of(k * tk, tk)
        z_tile = z_ref[pl.ds(start, tk), :]
    else:
        z_tile = z_ref[...]

    acc_ref[...] += jnp.dot(a_ref[...], z_tile,
                            preferred_element_type=jnp.float32)

    @pl.when(k == pl.num_programs(1) - 1)
    def _():
        res = acc_ref[...] + b_ref[...]
        if fuse_w2:
            h1 = jnp.maximum(res, 0.0).astype(jnp.bfloat16)
            # (tm,128)x(128,128) epilogue matmul hides under the A stream.
            res = jnp.dot(h1, w2_ref[...], preferred_element_type=jnp.float32)
        o_ref[...] = res.astype(o_ref.dtype)


def _graph_aggregate(a_bf, z, bias, *, w2, out_dtype, tm, tk, vmem_limit):
    """Tiled  out = A_hat @ Z + bias  (optionally fused with relu + @W2)."""
    n_pad = a_bf.shape[0]
    f_in = z.shape[1]
    f_out = w2.shape[1] if w2 is not None else f_in
    assert n_pad % tm == 0 and n_pad % tk == 0

    grid = (n_pad // tm, n_pad // tk)
    bias2d = bias.reshape(1, f_in).astype(jnp.float32)

    # Keep Z resident in VMEM (single DMA) when small; else re-stream per k.
    z_resident = (2 * n_pad * f_in * z.dtype.itemsize) <= (8 << 20)
    if z_resident:
        z_spec = pl.BlockSpec((n_pad, f_in), lambda i, k: (0, 0))
    else:
        z_spec = pl.BlockSpec((tk, f_in), lambda i, k: (k, 0))

    in_specs = [
        pl.BlockSpec((tm, tk), lambda i, k: (i, k)),      # A_hat tile
        z_spec,                                           # Z (resident / tile)
        pl.BlockSpec((1, f_in), lambda i, k: (0, 0)),     # bias row
    ]
    operands = [a_bf, z, bias2d]
    if w2 is not None:
        in_specs.append(pl.BlockSpec((f_in, f_out), lambda i, k: (0, 0)))
        operands.append(w2)

    flops = 2 * n_pad * n_pad * f_in
    if w2 is not None:
        flops += 2 * n_pad * f_in * f_out
    z_bytes = z.size * z.dtype.itemsize * (1 if z_resident else grid[0])
    bytes_accessed = (a_bf.size * a_bf.dtype.itemsize + z_bytes
                      + n_pad * f_out * jnp.dtype(out_dtype).itemsize)

    kernel = functools.partial(_agg_kernel, fuse_w2=w2 is not None,
                               z_resident=z_resident, tk=tk)

    return pl.pallas_call(
        kernel,
        out_shape=jax.ShapeDtypeStruct((n_pad, f_out), out_dtype),
        grid_spec=pltpu.PrefetchScalarGridSpec(
            num_scalar_prefetch=0,
            grid=grid,
            in_specs=in_specs,
            out_specs=pl.BlockSpec((tm, f_out), lambda i, k: (i, 0)),
            scratch_shapes=[pltpu.VMEM((tm, f_in), jnp.float32)],
        ),
        compiler_params=pltpu.CompilerParams(
            dimension_semantics=("parallel", "arbitrary"),
            vmem_limit_bytes=vmem_limit,
        ),
        cost_estimate=pl.CostEstimate(
            flops=flops, transcendentals=0, bytes_accessed=bytes_accessed),
    )(*operands)


def gcn_feedforward(a_hat, x, w1, b1, w2, b2):
    """Forward pass of GCNFeedforwardLayer (eval mode: dropout = identity).

    a_hat: (N,N), x: (N,Fin), w1: (Fin,H), b1: (H,), w2: (H,Fin), b2: (Fin,).
    """
    n, fin = x.shape
    hid = w1.shape[1]

    # Pad N only to a multiple of 256 (bf16-friendly), features to 128 lanes.
    n_pad = _round_up(n, 256)
    fin_pad = _round_up(fin, 128)
    hid_pad = _round_up(hid, 128)

    tm, tk, vmem_limit = _select_tiling(n_pad)

    # Fused pad + bf16 cast of A_hat (no padded-f32 intermediate in HBM).
    if n_pad == n:
        a_bf = a_hat.astype(jnp.bfloat16)
    else:
        a_bf = (jnp.zeros((n_pad, n_pad), jnp.bfloat16)
                .at[:n, :n].set(a_hat.astype(jnp.bfloat16)))

    x_pad = jnp.zeros((n_pad, fin_pad), jnp.float32).at[:n, :fin].set(x)
    w1_pad = jnp.zeros((fin_pad, hid_pad), jnp.float32).at[:fin, :hid].set(w1)
    b1_pad = jnp.zeros((hid_pad,), jnp.float32).at[:hid].set(b1)
    w2_pad = (jnp.zeros((hid_pad, fin_pad), jnp.bfloat16)
              .at[:hid, :fin].set(w2.astype(jnp.bfloat16)))
    b2_pad = jnp.zeros((fin_pad,), jnp.float32).at[:fin].set(b2)

    # Tiny first feature transform hoisted out of the A_hat reduction.
    z1 = jnp.dot(x_pad, w1_pad,
                 preferred_element_type=jnp.float32).astype(jnp.bfloat16)

    # Pass 1 (fused): Z2 = relu(A_hat @ Z1 + b1) @ W2   (no H1 HBM round-trip).
    # TODO(synk): training-mode dropout would apply pltpu.prng_seed +
    # pltpu.stateful_bernoulli to relu(acc+b1) inside this epilogue.
    z2 = _graph_aggregate(a_bf, z1, b1_pad, w2=w2_pad,
                          out_dtype=jnp.bfloat16, tm=tm, tk=tk,
                          vmem_limit=vmem_limit)

    # Pass 2: out = A_hat @ Z2 + b2
    out = _graph_aggregate(a_bf, z2, b2_pad, w2=None,
                           out_dtype=jnp.float32, tm=tm, tk=tk,
                           vmem_limit=vmem_limit)

    return out[:n, :fin]


def _reference_f32(a_hat, x, w1, b1, w2, b2):
    h1 = jnp.maximum(a_hat @ (x @ w1) + b1, 0.0)
    return a_hat @ (h1 @ w2) + b2


def _reference_matched(a_hat, x, w1, b1, w2, b2):
    """Same math with the kernel's bf16-input / f32-accumulate precision."""
    a_bf = a_hat.astype(jnp.bfloat16)
    z1 = jnp.dot(x, w1, preferred_element_type=jnp.float32).astype(jnp.bfloat16)
    h1 = jnp.maximum(
        jnp.dot(a_bf, z1, preferred_element_type=jnp.float32) + b1, 0.0
    ).astype(jnp.bfloat16)
    z2 = jnp.dot(h1, w2.astype(jnp.bfloat16),
                 preferred_element_type=jnp.float32).astype(jnp.bfloat16)
    return jnp.dot(a_bf, z2, preferred_element_type=jnp.float32) + b2


if __name__ == "__main__":
    N = 16          # number of graph nodes
    IN_FEATS = 8
    HIDDEN = 32

    key = jax.random.PRNGKey(0)
    k_adj, k_x, k_w1, k_w2 = jax.random.split(key, 4)

    # --- small symmetric graph and its normalized adjacency ---
    adj_rand = jax.random.uniform(k_adj, (N, N))
    adj = (adj_rand + adj_rand.T > 1.0).astype(jnp.float32)
    adj = adj * (1.0 - jnp.eye(N, dtype=jnp.float32))       # no self loops
    deg = jnp.sum(adj, axis=1)
    d_inv_sqrt = jnp.where(deg > 0, 1.0 / jnp.sqrt(deg), 0.0)
    a_hat = d_inv_sqrt[:, None] * adj * d_inv_sqrt[None, :]

    # --- node features ---
    x = jax.random.normal(k_x, (N, IN_FEATS), dtype=jnp.float32)

    # --- deterministic parameter init (Glorot-uniform, zero bias) ---
    def glorot(k, fan_in, fan_out):
        lim = jnp.sqrt(6.0 / (fan_in + fan_out))
        return jax.random.uniform(k, (fan_in, fan_out), jnp.float32, -lim, lim)

    w1 = glorot(k_w1, IN_FEATS, HIDDEN)
    b1 = jnp.zeros((HIDDEN,), jnp.float32)
    w2 = glorot(k_w2, HIDDEN, IN_FEATS)
    b2 = jnp.zeros((IN_FEATS,), jnp.float32)

    out = gcn_feedforward(a_hat, x, w1, b1, w2, b2)
    out = jax.block_until_ready(out)
    assert out.shape == (N, IN_FEATS)

    # Exact-precision-matched reference (bf16 MXU inputs, f32 accumulation).
    ref_m = _reference_matched(a_hat, x, w1, b1, w2, b2)
    assert jnp.allclose(out, ref_m, atol=5e-3, rtol=5e-3)

    # Loose sanity check against the pure-f32 module semantics.
    ref_f32 = _reference_f32(a_hat, x, w1, b1, w2, b2)
    assert jnp.allclose(out, ref_f32, atol=5e-2, rtol=5e-2)

    print("KERNEL_OK")
</pallas_src>

<mosaic_0001>
module attributes {stable_mosaic.version = 11 : i64} {
  func.func @_agg_kernel(%arg0: i32, %arg1: i32, %arg2: memref<256x256xbf16, #tpu.memory_space<vmem>>, %arg3: memref<256x128xbf16, #tpu.memory_space<vmem>>, %arg4: memref<1x128xf32, #tpu.memory_space<vmem>>, %arg5: memref<128x128xbf16, #tpu.memory_space<vmem>>, %arg6: memref<256x128xbf16, #tpu.memory_space<vmem>>, %arg7: memref<256x128xf32, #tpu.memory_space<vmem>>) attributes {dimension_semantics = [#tpu.dimension_semantics<parallel>, #tpu.dimension_semantics<arbitrary>], iteration_bounds = array<i64: 1, 1>, scalar_prefetch = 0 : i64, scratch_operands = 1 : i64, tpu.core_type = #tpu.core_type<tc>, window_params = [{transform_indices = @transform_0, window_bounds = array<i64: 256, 256>}, {pipeline_mode = #tpu.pipeline_mode<synchronous>, transform_indices = @transform_1, window_bounds = array<i64: 256, 128>}, {pipeline_mode = #tpu.pipeline_mode<synchronous>, transform_indices = @transform_2, window_bounds = array<i64: 1, 128>}, {pipeline_mode = #tpu.pipeline_mode<synchronous>, transform_indices = @transform_3, window_bounds = array<i64: 128, 128>}, {transform_indices = @transform_4, window_bounds = array<i64: 256, 128>}]} {
    %c0_i32 = arith.constant 0 : i32
    %0 = arith.cmpi eq, %arg1, %c0_i32 : i32
    %1 = arith.extui %0 : i1 to i32
    %c0_i32_0 = arith.constant 0 : i32
    %2 = arith.cmpi ne, %1, %c0_i32_0 : i32
    scf.if %2 {
      %cst_9 = arith.constant 0.000000e+00 : f32
      %15 = vector.broadcast %cst_9 : f32 to vector<256x128xf32>
      %c0_10 = arith.constant 0 : index
      %c0_11 = arith.constant 0 : index
      %16 = vector.load %arg7[%c0_10, %c0_11] : memref<256x128xf32, #tpu.memory_space<vmem>>, vector<256x128xf32>
      tpu.vector_store %arg7[%c0_10, %c0_11], %15 {strides = array<i32>} : memref<256x128xf32, #tpu.memory_space<vmem>>, vector<256x128xf32>,
    } else {
    }
    %c256_i32 = arith.constant 256 : i32
    %3 = arith.muli %arg1, %c256_i32 : i32
    %4 = tpu.assume_multiple %3, 256 : i32
    %5 = arith.index_cast %4 : i32 to index
    %c0 = arith.constant 0 : index
    %6 = vector.load %arg3[%5, %c0] : memref<256x128xbf16, #tpu.memory_space<vmem>>, vector<256x128xbf16>
    %c0_1 = arith.constant 0 : index
    %c0_2 = arith.constant 0 : index
    %7 = vector.load %arg7[%c0_1, %c0_2] : memref<256x128xf32, #tpu.memory_space<vmem>>, vector<256x128xf32>
    %c0_3 = arith.constant 0 : index
    %c0_4 = arith.constant 0 : index
    %8 = vector.load %arg2[%c0_3, %c0_4] : memref<256x256xbf16, #tpu.memory_space<vmem>>, vector<256x256xbf16>
    %cst = arith.constant dense<0.000000e+00> : vector<256x128xf32>
    %9 = tpu.matmul %8, %6, %cst {dimension_numbers = #tpu.dot_dimension_numbers<[1], [0], [0], [1], [0, 0, 1, 1], [], []>} : vector<256x256xbf16>, vector<256x128xbf16>, vector<256x128xf32> -> vector<256x128xf32>
    %10 = arith.addf %7, %9 : vector<256x128xf32>
    %c0_5 = arith.constant 0 : index
    %c0_6 = arith.constant 0 : index
    %11 = vector.load %arg7[%c0_5, %c0_6] : memref<256x128xf32, #tpu.memory_space<vmem>>, vector<256x128xf32>
    tpu.vector_store %arg7[%c0_5, %c0_6], %10 {strides = array<i32>} : memref<256x128xf32, #tpu.memory_space<vmem>>, vector<256x128xf32>,
    %c0_i32_7 = arith.constant 0 : i32
    %12 = arith.cmpi eq, %arg1, %c0_i32_7 : i32
    %13 = arith.extui %12 : i1 to i32
    %c0_i32_8 = arith.constant 0 : i32
    %14 = arith.cmpi ne, %13, %c0_i32_8 : i32
    scf.if %14 {
      %c0_9 = arith.constant 0 : index
      %c0_10 = arith.constant 0 : index
      %15 = vector.load %arg7[%c0_9, %c0_10] : memref<256x128xf32, #tpu.memory_space<vmem>>, vector<256x128xf32>
      %c0_11 = arith.constant 0 : index
      %c0_12 = arith.constant 0 : index
      %16 = vector.load %arg4[%c0_11, %c0_12] : memref<1x128xf32, #tpu.memory_space<vmem>>, vector<1x128xf32>
      %17 = vector.broadcast %16 : vector<1x128xf32> to vector<256x128xf32>
      %18 = arith.addf %15, %17 : vector<256x128xf32>
      %cst_13 = arith.constant 0.000000e+00 : f32
      %19 = vector.broadcast %cst_13 : f32 to vector<256x128xf32>
      %20 = arith.maximumf %18, %19 : vector<256x128xf32>
      %21 = arith.truncf %20 : vector<256x128xf32> to vector<256x128xbf16>
      %c0_14 = arith.constant 0 : index
      %c0_15 = arith.constant 0 : index
      %22 = vector.load %arg5[%c0_14, %c0_15] : memref<128x128xbf16, #tpu.memory_space<vmem>>, vector<128x128xbf16>
      %cst_16 = arith.constant dense<0.000000e+00> : vector<256x128xf32>
      %23 = tpu.matmul %21, %22, %cst_16 {dimension_numbers = #tpu.dot_dimension_numbers<[1], [0], [0], [1], [0, 0, 1, 1], [], []>} : vector<256x128xbf16>, vector<128x128xbf16>, vector<256x128xf32> -> vector<256x128xf32>
      %24 = arith.truncf %23 : vector<256x128xf32> to vector<256x128xbf16>
      %c0_17 = arith.constant 0 : index
      %c0_18 = arith.constant 0 : index
      %25 = vector.load %arg6[%c0_17, %c0_18] : memref<256x128xbf16, #tpu.memory_space<vmem>>, vector<256x128xbf16>
      tpu.vector_store %arg6[%c0_17, %c0_18], %24 {strides = array<i32>} : memref<256x128xbf16, #tpu.memory_space<vmem>>, vector<256x128xbf16>,
    } else {
    }
    return
  }
  func.func @transform_0(%arg0: i32, %arg1: i32) -> (i32, i32) {
    %c0_i32 = arith.constant 0 : i32
    return %arg0, %arg1 : i32, i32
  }
  func.func @transform_1(%arg0: i32, %arg1: i32) -> (i32, i32) {
    %c0_i32 = arith.constant 0 : i32
    %c0_i32_0 = arith.constant 0 : i32
    %c0_i32_1 = arith.constant 0 : i32
    return %c0_i32, %c0_i32_0 : i32, i32
  }
  func.func @transform_2(%arg0: i32, %arg1: i32) -> (i32, i32) {
    %c0_i32 = arith.constant 0 : i32
    %c0_i32_0 = arith.constant 0 : i32
    %c0_i32_1 = arith.constant 0 : i32
    return %c0_i32, %c0_i32_0 : i32, i32
  }
  func.func @transform_3(%arg0: i32, %arg1: i32) -> (i32, i32) {
    %c0_i32 = arith.constant 0 : i32
    %c0_i32_0 = arith.constant 0 : i32
    %c0_i32_1 = arith.constant 0 : i32
    return %c0_i32, %c0_i32_0 : i32, i32
  }
  func.func @transform_4(%arg0: i32, %arg1: i32) -> (i32, i32) {
    %c0_i32 = arith.constant 0 : i32
    %c0_i32_0 = arith.constant 0 : i32
    return %arg0, %c0_i32 : i32, i32
  }
}

</mosaic_0001>

<bundles_post_ra>
// kernel: tpu_custom_call.1
= control target key start
LH: loop header
LB: loop body
LE: loop exit
PB: predicated region body
PF: predicated region fallthrough
CT: control target
= control target key end

     0   :  { %9 = vsyncpa [#allocation4], 0  ;;  %s1934_s0 = inlined_call_operand.hbm [shape: bf16[256,256], index: 0, kind: input, shape index: {}]   ;;  %s1935_s1 = inlined_call_operand.hbm [shape: bf16[256,128], index: 1, kind: input, shape index: {}]   ;;  %s1936_s2 = inlined_call_operand.vmem [shape: f32[1,128], index: 2, kind: input, shape index: {}]   ;;  %s1937_s3 = inlined_call_operand.hbm [shape: bf16[128,128], index: 3, kind: input, shape index: {}]   ;;  %s1938_s4 = inlined_call_operand.hbm [shape: bf16[256,128], index: 4, kind: output, shape index: {}]  }
   0x1   :  { %10 = vsyncpa [#allocation7], 0 }
   0x2   :  { %11 = vsyncpa [#allocation5], 0  ;;  %s1795_s15 = smov [#allocation6]   ;;  %s1701_s19 = scalar_lea.hbm %s1935_s1, 2048 }
   0x3   :  { %s29_s16 = sshll.u32 %s1795_s15, 4  ;;  %p1702_p0 = scmp.ne.s32.totalorder %s1935_s1, %s1701_s19  ;;  %s30_s16 = int_to_ptr.vmem [resolvable:$true] %s29_s16 }
   0x4   :  { %p1705_p1 = scmp.lt.u32.totalorder %s1701_s19, %s1935_s1 }
   0x6   :  { %p1707_p2 = pnand %p1705_p1, %p1702_p0 }
   0x8   :  { %1710 = shalt.err (!%p1707_p2)
}
   0x9   :  { %s1711_s24 = scalar_lea.vmem %s30_s16, 2048  ;;  %p1716_p4 = scmp.lt.s32.totalorder %s30_s16, %s30_s16 }
   0xa   :  { %p1712_p3 = scmp.ne.s32.totalorder %s30_s16, %s1711_s24  ;;  %p1717_p5 = scmp.lt.s32.totalorder %s1711_s24, %s1711_s24 }
   0xc   :  { %p1718_p6 = por %p1717_p5, %p1716_p4 }
   0xe   :  { %p1719_p7 = pnand %p1718_p6, %p1712_p3 }
  0x10   :  { %1722 = shalt.err (!%p1719_p7)
}
  0x11   :  { %s1796_s25 = smov 64   ;;  %s1797_s26 = smov 4  }
  0x12   :  { %35 = dma.hbm_to_vmem [thread:$0]  %s1935_s1, 2048, %s30_s16, [#allocation7], %s1796_s25, %s1796_s25, %s1797_s26  }
  0x13   :  { %s1798_s29 = smov [#allocation3]   ;;  %s1723_s7 = scalar_lea.hbm %s1934_s0, 4096 }
  0x14   :  { %s17_s30 = sshll.u32 %s1798_s29, 4  ;;  %p1724_p8 = scmp.ne.s32.totalorder %s1934_s0, %s1723_s7  ;;  %s18_s30 = int_to_ptr.vmem [resolvable:$true] %s17_s30 }
  0x15   :  { %p1727_p9 = scmp.lt.u32.totalorder %s1723_s7, %s1934_s0 }
  0x17   :  { %p1729_p10 = pnand %p1727_p9, %p1724_p8 }
  0x19   :  { %1732 = shalt.err (!%p1729_p10)
}
  0x1a   :  { %s1733_s12 = scalar_lea.vmem %s18_s30, 4096  ;;  %p1738_p12 = scmp.lt.s32.totalorder %s18_s30, %s18_s30 }
  0x1b   :  { %p1734_p11 = scmp.ne.s32.totalorder %s18_s30, %s1733_s12  ;;  %p1739_p13 = scmp.lt.s32.totalorder %s1733_s12, %s1733_s12 }
  0x1d   :  { %p1740_p0 = por %p1739_p13, %p1738_p12 }
  0x1f   :  { %p1741_p1 = pnand %p1740_p0, %p1734_p11 }
  0x21   :  { %1744 = shalt.err (!%p1741_p1)
}
  0x22   :  { %s1799_s1 = smov 128   ;;  %s1800_s13 = smov 8  }
  0x23   :  { %23 = dma.hbm_to_vmem [thread:$0]  %s1934_s0, 4096, %s18_s30, [#allocation4], %s1799_s1, %s1799_s1, %s1800_s13  }
  0x24   :  { %s1801_s16 = smov [#allocation8]   ;;  %s1745_s20 = scalar_lea.hbm %s1937_s3, 1024 }
  0x25   :  { %s43_s17 = sshll.u32 %s1801_s16, 4  ;;  %p1746_p2 = scmp.ne.s32.totalorder %s1937_s3, %s1745_s20  ;;  %s44_s17 = int_to_ptr.vmem [resolvable:$true] %s43_s17 }
  0x26   :  { %p1749_p3 = scmp.lt.u32.totalorder %s1745_s20, %s1937_s3 }
  0x28   :  { %p1751_p4 = pnand %p1749_p3, %p1746_p2 }
  0x2a   :  { %1754 = shalt.err (!%p1751_p4)
}
  0x2b   :  { %s1755_s27 = scalar_lea.vmem %s44_s17, 1024  ;;  %p1760_p6 = scmp.lt.s32.totalorder %s44_s17, %s44_s17 }
  0x2c   :  { %p1756_p5 = scmp.ne.s32.totalorder %s44_s17, %s1755_s27  ;;  %p1761_p7 = scmp.lt.s32.totalorder %s1755_s27, %s1755_s27 }
  0x2e   :  { %p1762_p8 = por %p1761_p7, %p1760_p6 }
  0x30   :  { %p1763_p9 = pnand %p1762_p8, %p1756_p5 }
  0x32   :  { %1766 = shalt.err (!%p1763_p9)
}
  0x33   :  { %49 = dma.hbm_to_vmem [thread:$0]  %s1937_s3, 1024, %s44_s17, [#allocation7], %s1796_s25, %s1796_s25, %s1797_s26  }
  0x34   :  { %1789 = dma.done.wait [#allocation4], 4096  }
  0x35   :  { %1790 = vsyncadd [#allocation4], 4294963200 }
  0x36   :  { %1791 = dma.done.wait [#allocation7], 3072  }
  0x37   :  { %1792 = vsyncadd [#allocation7], 4294964224  ;;  %v1629_v0 = vld [vmem:[#allocation6 + $0x40] sm:$0xff]   ;;  %v1631_v2 = vld [vmem:[#allocation6 + $0x48] sm:$0xff]  }
  0x38   :  { %v1630_v1 = vld [vmem:[#allocation6] sm:$0xff]   ;;  %1421 = vmatprep.subr.bf16.mxu0 %v1629_v0  ;;  %1605 = vmatprep.subr.bf16.mxu1 %v1629_v0  ;;  %v1632_v3 = vld [vmem:[#allocation6 + $0x8] sm:$0xff]   ;;  %v1633_v4 = vld [vmem:[#allocation6 + $0x50] sm:$0xff]  }
  0x39   :  { %1422 = vmatpush3.bf16.msra.mxu0 %v1630_v1  ;;  %1613 = vmatpush3.bf16.msra.mxu1 %v1630_v1  ;;  %v1634_v5 = vld [vmem:[#allocation6 + $0x10] sm:$0xff]   ;;  %v1635_v6 = vld [vmem:[#allocation6 + $0x58] sm:$0xff]   ;;  %v1637_v8 = vld [vmem:[#allocation6 + $0x60] sm:$0xff]  }
  0x3a   :  { %1423 = vmatprep.subr.bf16.mxu0 %v1631_v2  ;;  %1606 = vmatprep.subr.bf16.mxu1 %v1631_v2  ;;  %v1636_v7 = vld [vmem:[#allocation6 + $0x18] sm:$0xff]   ;;  %v1638_v9 = vld [vmem:[#allocation6 + $0x20] sm:$0xff]   ;;  %v1639_v10 = vld [vmem:[#allocation6 + $0x68] sm:$0xff]  }
  0x3b   :  { %v1647_v11 = vld [vmem:[#allocation3 + $0x4] ss:$8 sps:$4 sm:$0xff]   ;;  %v1641_v13 = vld [vmem:[#allocation6 + $0x70] sm:$0xff]   ;;  %v1643_v15 = vld [vmem:[#allocation6 + $0x78] sm:$0xff]  }
  0x3c   :  { %v1640_v12 = vld [vmem:[#allocation6 + $0x28] sm:$0xff]   ;;  %485 = vmatprep.mubr.bf16.mxu0 %v1647_v11  ;;  %v1642_v14 = vld [vmem:[#allocation6 + $0x30] sm:$0xff]   ;;  %v1644_v16 = vld [vmem:[#allocation6 + $0x38] sm:$0xff]  }
  0x3d   :  { %1424 = vmatpush3.bf16.msra.mxu0 %v1632_v3  ;;  %1614 = vmatpush3.bf16.msra.mxu1 %v1632_v3  ;;  %v1645_v17 = vld [vmem:[#allocation3] ss:$8 sps:$4 sm:$0xff]   ;;  %v1677_v18 = vld [vmem:[#allocation3 + $0xc4] ss:$8 sps:$4 sm:$0xff]   ;;  %v1648_v19 = vld [vmem:[#allocation3 + $0x14] ss:$8 sps:$4 sm:$0xff]  }
  0x3e   :  { %1425 = vmatprep.subr.bf16.mxu0 %v1633_v4  ;;  %1607 = vmatprep.subr.bf16.mxu1 %v1633_v4  ;;  %v1675_v20 = vld [vmem:[#allocation3 + $0xc0] ss:$8 sps:$4 sm:$0xff]   ;;  %v1681_v21 = vld [vmem:[#allocation3 + $0xd4] ss:$8 sps:$4 sm:$0xff]   ;;  %v1650_v22 = vld [vmem:[#allocation3 + $0x10] ss:$8 sps:$4 sm:$0xff]  }
  0x3f   :  { %581 = vmatprep.mubr.bf16.mxu1 %v1677_v18  ;;  %v1651_v23 = vld [vmem:[#allocation3 + $0x24] ss:$8 sps:$4 sm:$0xff]   ;;  %v1683_v24 = vld [vmem:[#allocation3 + $0xd0] ss:$8 sps:$4 sm:$0xff]   ;;  %v1653_v29 = vld [vmem:[#allocation3 + $0x20] ss:$8 sps:$4 sm:$0xff]  }
  0x40   :  { %v1687_v25 = vld [vmem:[#allocation3 + $0xe4] ss:$8 sps:$4 sm:$0xff]   ;;  %v1695_v28 = vld [vmem:[#allocation8 + $0x10] sm:$0xff]   ;;  %v1689_v31 = vld [vmem:[#allocation3 + $0xe0] ss:$8 sps:$4 sm:$0xff]  }
  0x41   :  { %1426 = vmatpush3.bf16.msra.mxu0 %v1634_v5  ;;  %1615 = vmatpush3.bf16.msra.mxu1 %v1634_v5  ;;  %v1693_v26 = vld [vmem:[#allocation8] sm:$0xff]   ;;  %v1694_v27 = vld [vmem:[#allocation8 + $0x8] sm:$0xff]   ;;  %v1654_v30 = vld [vmem:[#allocation3 + $0x34] ss:$8 sps:$4 sm:$0xff]  }
  0x42   :  { %1427 = vmatprep.subr.bf16.mxu0 %v1635_v6  ;;  %1608 = vmatprep.subr.bf16.mxu1 %v1635_v6  ;;  %v1690_v32 = vld [vmem:[#allocation3 + $0xf4] ss:$8 sps:$4 sm:$0xff]   ;;  %v1656_v33 = vld [vmem:[#allocation3 + $0x30] ss:$8 sps:$4 sm:$0xff]   ;;  %v1657_v34 = vld [vmem:[#allocation3 + $0x44] ss:$8 sps:$4 sm:$0xff]  }
  0x43   :  { %v1692_v35 = vld [vmem:[#allocation3 + $0xf0] ss:$8 sps:$4 sm:$0xff]   ;;  %v1659_v36 = vld [vmem:[#allocation3 + $0x40] ss:$8 sps:$4 sm:$0xff]   ;;  %v1660_v37 = vld [vmem:[#allocation3 + $0x54] ss:$8 sps:$4 sm:$0xff]  }
  0x44   :  { %v1662_v38 = vld [vmem:[#allocation3 + $0x50] ss:$8 sps:$4 sm:$0xff]   ;;  %v1663_v39 = vld [vmem:[#allocation3 + $0x64] ss:$8 sps:$4 sm:$0xff]   ;;  %v1665_v40 = vld [vmem:[#allocation3 + $0x60] ss:$8 sps:$4 sm:$0xff]  }
  0x45   :  { %1428 = vmatpush3.bf16.msra.mxu0 %v1636_v7  ;;  %1616 = vmatpush3.bf16.msra.mxu1 %v1636_v7  ;;  %v1666_v41 = vld [vmem:[#allocation3 + $0x74] ss:$8 sps:$4 sm:$0xff]   ;;  %v1668_v42 = vld [vmem:[#allocation3 + $0x70] ss:$8 sps:$4 sm:$0xff]   ;;  %v1669_v43 = vld [vmem:[#allocation3 + $0x84] ss:$8 sps:$4 sm:$0xff]  }
  0x46   :  { %1429 = vmatprep.subr.bf16.mxu0 %v1637_v8  ;;  %1609 = vmatprep.subr.bf16.mxu1 %v1637_v8  ;;  %v1671_v44 = vld [vmem:[#allocation3 + $0x80] ss:$8 sps:$4 sm:$0xff]   ;;  %v1672_v45 = vld [vmem:[#allocation3 + $0x94] ss:$8 sps:$4 sm:$0xff]   ;;  %v1674_v46 = vld [vmem:[#allocation3 + $0x90] ss:$8 sps:$4 sm:$0xff]  }
  0x47   :  { %v1678_v47 = vld [vmem:[#allocation3 + $0xa4] ss:$8 sps:$4 sm:$0xff]   ;;  %v1680_v48 = vld [vmem:[#allocation3 + $0xa0] ss:$8 sps:$4 sm:$0xff]   ;;  %v1684_v49 = vld [vmem:[#allocation3 + $0xb4] ss:$8 sps:$4 sm:$0xff]  }
  0x48   :  { %v1696_v50 = vld [vmem:[#allocation8 + $0x18] sm:$0xff]   ;;  %v1697_v52 = vld [vmem:[#allocation8 + $0x20] sm:$0xff]   ;;  %v1698_v53 = vld [vmem:[#allocation8 + $0x28] sm:$0xff]  }
  0x49   :  { %1430 = vmatpush3.bf16.msra.mxu0 %v1638_v9  ;;  %1617 = vmatpush3.bf16.msra.mxu1 %v1638_v9  ;;  %v1686_v51 = vld [vmem:[#allocation3 + $0xb0] ss:$8 sps:$4 sm:$0xff]   ;;  %v1873_v58 = vld [vmem:[%s1936_s2] ss:$0 sm:$0xff]  ;;  %s1802_s2 = smov [#allocation9]  }
  0x4a   :  { %1431 = vmatprep.subr.bf16.mxu0 %v1639_v10  ;;  %1610 = vmatprep.subr.bf16.mxu1 %v1639_v10  ;;  %v1699_v54 = vld [vmem:[#allocation8 + $0x30] sm:$0xff]   ;;  %v1700_v55 = vld [vmem:[#allocation8 + $0x38] sm:$0xff]   ;;  %s1190_s30 = sshll.u32 %s1802_s2, 4  ;;  %s1191_s30 = int_to_ptr.vmem [resolvable:$true] %s1190_s30 }
  0x4b   :  { %s1767_s5 = scalar_lea.vmem %s1191_s30, 2048  ;;  %p1772_p11 = scmp.lt.s32.totalorder %s1191_s30, %s1191_s30 }
  0x4c   :  { %p1768_p10 = scmp.ne.s32.totalorder %s1191_s30, %s1767_s5  ;;  %p1773_p12 = scmp.lt.s32.totalorder %s1767_s5, %s1767_s5 }
  0x4d   :  { %1432 = vmatpush3.bf16.msra.mxu0 %v1640_v12  ;;  %1618 = vmatpush3.bf16.msra.mxu1 %v1640_v12 }
  0x4e   :  { %1433 = vmatprep.subr.bf16.mxu0 %v1641_v13  ;;  %1611 = vmatprep.subr.bf16.mxu1 %v1641_v13  ;;  %p1774_p13 = por %p1773_p12, %p1772_p11 }
  0x50   :  { %p1775_p0 = pnand %p1774_p13, %p1768_p10 }
  0x51   :  { %1434 = vmatpush3.bf16.msra.mxu0 %v1642_v14  ;;  %1619 = vmatpush3.bf16.msra.mxu1 %v1642_v14 }
  0x52   :  { %1435 = vmatprep.subr.bf16.mxu0 %v1643_v15  ;;  %1612 = vmatprep.subr.bf16.mxu1 %v1643_v15 }
  0x55   :  { %1436 = vmatpush3.bf16.msra.mxu0 %v1644_v16  ;;  %1620 = vmatpush3.bf16.msra.mxu1 %v1644_v16 }
  0x56   :  { %1557 = vmatprep.subr.bf16.mxu1 %v1693_v26 }
  0x58   :  { %486 = vmatmul.mubr.bf16.vlgmr.msra.gmra.mrb[0].mxu0 %v1645_v17  ;;  %582 = vmatmul.mubr.bf16.vlgmr.msra.gmra.mrb[0].mxu1 %v1675_v20 }
  0x59   :  { %493 = vmatprep.mubr.bf16.mxu0 %v1648_v19  ;;  %589 = vmatprep.mubr.bf16.mxu1 %v1681_v21 }
  0x5a   :  { %1558 = vmatpush3.bf16.msra.mxu1 %v1693_v26 }
  0x5b   :  { %1559 = vmatprep.subr.bf16.mxu1 %v1694_v27 }
  0x5e   :  { %1560 = vmatpush3.bf16.msra.mxu1 %v1694_v27 }
  0x5f   :  { %1561 = vmatprep.subr.bf16.mxu1 %v1695_v28 }
  0x60   :  { %494 = vmatmul.mubr.bf16.gmra.mrb[4].mxu0 %v1650_v22  ;;  %590 = vmatmul.mubr.bf16.gmra.mrb[4].mxu1 %v1683_v24 }
  0x61   :  { %501 = vmatprep.mubr.bf16.mxu0 %v1651_v23  ;;  %597 = vmatprep.mubr.bf16.mxu1 %v1687_v25 }
  0x62   :  { %1562 = vmatpush3.bf16.msra.mxu1 %v1695_v28 }
  0x63   :  { %1563 = vmatprep.subr.bf16.mxu1 %v1696_v50 }
  0x66   :  { %1564 = vmatpush3.bf16.msra.mxu1 %v1696_v50 }
  0x67   :  { %1565 = vmatprep.subr.bf16.mxu1 %v1697_v52 }
  0x68   :  { %502 = vmatmul.mubr.bf16.gmra.mrb[8].mxu0 %v1653_v29  ;;  %598 = vmatmul.mubr.bf16.gmra.mrb[8].mxu1 %v1689_v31 }
  0x69   :  { %509 = vmatprep.mubr.bf16.mxu0 %v1654_v30  ;;  %605 = vmatprep.mubr.bf16.mxu1 %v1690_v32 }
  0x6a   :  { %1566 = vmatpush3.bf16.msra.mxu1 %v1697_v52 }
  0x6b   :  { %1567 = vmatprep.subr.bf16.mxu1 %v1698_v53 }
  0x6e   :  { %1568 = vmatpush3.bf16.msra.mxu1 %v1698_v53 }
  0x6f   :  { %1569 = vmatprep.subr.bf16.mxu1 %v1699_v54 }
  0x70   :  { %510 = vmatmul.mubr.bf16.gmra.mrb[12].mxu0 %v1656_v33  ;;  %606 = vmatmul.mubr.bf16.gmra.mrb[12].mxu1 %v1692_v35 }
  0x71   :  { %517 = vmatprep.mubr.bf16.mxu0 %v1657_v34 }
  0x72   :  { %1570 = vmatpush3.bf16.msra.mxu1 %v1699_v54 }
  0x73   :  { %1571 = vmatprep.subr.bf16.mxu1 %v1700_v55 }
  0x76   :  { %1572 = vmatpush3.bf16.msra.mxu1 %v1700_v55 }
  0x78   :  { %518 = vmatmul.mubr.bf16.gmra.mrb[16].mxu0 %v1659_v36 }
  0x79   :  { %525 = vmatprep.mubr.bf16.mxu0 %v1660_v37 }
  0x80   :  { %526 = vmatmul.mubr.bf16.gmra.mrb[20].mxu0 %v1662_v38 }
  0x81   :  { %533 = vmatprep.mubr.bf16.mxu0 %v1663_v39 }
  0x88   :  { %534 = vmatmul.mubr.bf16.gmra.mrb[24].mxu0 %v1665_v40 }
  0x89   :  { %541 = vmatprep.mubr.bf16.mxu0 %v1666_v41 }
  0x90   :  { %542 = vmatmul.mubr.bf16.gmra.mrb[28].mxu0 %v1668_v42 }
  0x91   :  { %549 = vmatprep.mubr.bf16.mxu0 %v1669_v43 }
  0x98   :  { %550 = vmatmul.mubr.bf16.gmra.mrb[32].mxu0 %v1671_v44 }
  0x99   :  { %557 = vmatprep.mubr.bf16.mxu0 %v1672_v45 }
  0xa0   :  { %558 = vmatmul.mubr.bf16.gmra.mrb[36].mxu0 %v1674_v46 }
  0xa1   :  { %565 = vmatprep.mubr.bf16.mxu0 %v1678_v47 }
  0xa8   :  { %566 = vmatmul.mubr.bf16.gmra.mrb[40].mxu0 %v1680_v48 }
  0xa9   :  { %573 = vmatprep.mubr.bf16.mxu0 %v1684_v49 }
  0xb0   :  { %574 = vmatmul.mubr.bf16.gmra.mrb[44].mxu0 %v1686_v51 }
 0x12b   :  { %v1437_v56 = vpop.f32.mrb[0].mxu0  ;;  %v1509_v59 = vpop.f32.mrb[0].mxu1 }
 0x12c   :  { %v1438_v57 = vpop.f32.mrb[1].mxu0  ;;  %v1510_v62 = vpop.f32.mrb[1].mxu1 }
 0x12d   :  { %v1439_v60 = vadd.f32 %v1438_v57, %v1437_v56  ;;  %v1440_v61 = vpop.f32.mrb[2].mxu0  ;;  %v1511_v0 = vadd.f32 %v1510_v62, %v1509_v59  ;;  %v1512_v1 = vpop.f32.mrb[2].mxu1 }
 0x12e   :  { %v1441_v63 = vpop.f32.mrb[3].mxu0  ;;  %v1513_v4 = vpop.f32.mrb[3].mxu1 }
 0x12f   :  { %v720_v2 = vadd.f32 %v1439_v60, %v1873_v58  ;;  %v1442_v3 = vadd.f32 %v1441_v63, %v1440_v61  ;;  %v744_v5 = vadd.f32 %v1511_v0, %v1873_v58  ;;  %v1514_v6 = vadd.f32 %v1513_v4, %v1512_v1 }
 0x131   :  { %v721_v7 = vadd.f32 %v1442_v3, %v1873_v58  ;;  %v776_v8 = vmax.f32 %v744_v5, 0.0  ;;  %v745_v9 = vadd.f32 %v1514_v6, %v1873_v58  ;;  %v752_v10 = vmax.f32 %v720_v2, 0.0 }
 0x133   :  { %v753_v11 = vmax.f32 %v721_v7, 0.0  ;;  %v1443_v12 = vpop.f32.mrb[4].mxu0  ;;  %v777_v14 = vmax.f32 %v745_v9, 0.0  ;;  %v1515_v15 = vpop.f32.mrb[4].mxu1 }
 0x134   :  { %v1444_v13 = vpop.f32.mrb[5].mxu0  ;;  %v1516_v19 = vpop.f32.mrb[5].mxu1 }
 0x135   :  { %v1445_v16 = vadd.f32 %v1444_v13, %v1443_v12  ;;  %v1446_v17 = vpop.f32.mrb[6].mxu0  ;;  %v784_v18 = vpack.c.bf16 %v753_v11, %v752_v10  ;;  %v1517_v21 = vadd.f32 %v1516_v19, %v1515_v15  ;;  %v1518_v22 = vpop.f32.mrb[6].mxu1  ;;  %v1879_v23 = vpack.c.bf16 %v777_v14, %v776_v8 }
 0x136   :  { %v1447_v20 = vpop.f32.mrb[7].mxu0  ;;  %v1519_v26 = vpop.f32.mrb[7].mxu1 }
 0x137   :  { %v722_v24 = vadd.f32 %v1445_v16, %v1873_v58  ;;  %v1448_v25 = vadd.f32 %v1447_v20, %v1446_v17  ;;  %1573 = vmatprep.mubr.bf16.mxu1 %v784_v18  ;;  %v746_v27 = vadd.f32 %v1517_v21, %v1873_v58  ;;  %v1520_v28 = vadd.f32 %v1519_v26, %v1518_v22 }
 0x139   :  { %v723_v29 = vadd.f32 %v1448_v25, %v1873_v58  ;;  %v778_v30 = vmax.f32 %v746_v27, 0.0  ;;  %v747_v31 = vadd.f32 %v1520_v28, %v1873_v58  ;;  %v754_v32 = vmax.f32 %v722_v24, 0.0 }
 0x13b   :  { %v755_v33 = vmax.f32 %v723_v29, 0.0  ;;  %v1449_v34 = vpop.f32.mrb[8].mxu0  ;;  %v779_v36 = vmax.f32 %v747_v31, 0.0  ;;  %v1521_v37 = vpop.f32.mrb[8].mxu1 }
 0x13c   :  { %v1450_v35 = vpop.f32.mrb[9].mxu0  ;;  %v1522_v41 = vpop.f32.mrb[9].mxu1 }
 0x13d   :  { %v785_v38 = vpack.c.bf16 %v755_v33, %v754_v32  ;;  %v1451_v39 = vadd.f32 %v1450_v35, %v1449_v34  ;;  %v1452_v40 = vpop.f32.mrb[10].mxu0  ;;  %v1523_v43 = vadd.f32 %v1522_v41, %v1521_v37  ;;  %v1524_v44 = vpop.f32.mrb[10].mxu1  ;;  %v1885_v45 = vpack.c.bf16 %v779_v36, %v778_v30 }
 0x13e   :  { %v1453_v42 = vpop.f32.mrb[11].mxu0  ;;  %v1525_v48 = vpop.f32.mrb[11].mxu1 }
 0x13f   :  { %v724_v46 = vadd.f32 %v1451_v39, %v1873_v58  ;;  %v1454_v47 = vadd.f32 %v1453_v42, %v1452_v40  ;;  %1574 = vmatmul.mubr.bf16.vlgmr.msra.gmra.mrb[16].mxu1 %v785_v38  ;;  %v748_v49 = vadd.f32 %v1523_v43, %v1873_v58  ;;  %v1526_v50 = vadd.f32 %v1525_v48, %v1524_v44 }
 0x141   :  { %v725_v51 = vadd.f32 %v1454_v47, %v1873_v58  ;;  %v780_v52 = vmax.f32 %v748_v49, 0.0  ;;  %v749_v53 = vadd.f32 %v1526_v50, %v1873_v58  ;;  %v756_v54 = vmax.f32 %v724_v46, 0.0 }
 0x143   :  { %v757_v55 = vmax.f32 %v725_v51, 0.0  ;;  %v1455_v56 = vpop.f32.mrb[12].mxu0  ;;  %v781_v59 = vmax.f32 %v749_v53, 0.0  ;;  %v1527_v60 = vpop.f32.mrb[12].mxu1 }
 0x144   :  { %v1456_v57 = vpop.f32.mrb[13].mxu0  ;;  %v1528_v0 = vpop.f32.mrb[13].mxu1 }
 0x145   :  { %v1457_v61 = vadd.f32 %v1456_v57, %v1455_v56  ;;  %v1458_v62 = vpop.f32.mrb[14].mxu0  ;;  %v786_v63 = vpack.c.bf16 %v757_v55, %v756_v54  ;;  %v1529_v2 = vadd.f32 %v1528_v0, %v1527_v60  ;;  %v1530_v3 = vpop.f32.mrb[14].mxu1  ;;  %v1891_v4 = vpack.c.bf16 %v781_v59, %v780_v52 }
 0x146   :  { %v1459_v1 = vpop.f32.mrb[15].mxu0  ;;  %v1531_v7 = vpop.f32.mrb[15].mxu1 }
 0x147   :  { %v726_v5 = vadd.f32 %v1457_v61, %v1873_v58  ;;  %v1460_v6 = vadd.f32 %v1459_v1, %v1458_v62  ;;  %1577 = vmatprep.mubr.bf16.mxu1 %v786_v63  ;;  %v750_v8 = vadd.f32 %v1529_v2, %v1873_v58  ;;  %v1532_v9 = vadd.f32 %v1531_v7, %v1530_v3 }
 0x149   :  { %v727_v10 = vadd.f32 %v1460_v6, %v1873_v58  ;;  %v782_v11 = vmax.f32 %v750_v8, 0.0  ;;  %v751_v12 = vadd.f32 %v1532_v9, %v1873_v58  ;;  %v758_v13 = vmax.f32 %v726_v5, 0.0 }
 0x14b   :  { %v759_v14 = vmax.f32 %v727_v10, 0.0  ;;  %v1461_v15 = vpop.f32.mrb[16].mxu0  ;;  %v783_v17 = vmax.f32 %v751_v12, 0.0 }
 0x14c   :  { %v1462_v16 = vpop.f32.mrb[17].mxu0 }
 0x14d   :  { %v1463_v18 = vadd.f32 %v1462_v16, %v1461_v15  ;;  %v1464_v19 = vpop.f32.mrb[18].mxu0  ;;  %v787_v20 = vpack.c.bf16 %v759_v14, %v758_v13  ;;  %v1897_v22 = vpack.c.bf16 %v783_v17, %v782_v11 }
 0x14e   :  { %v1465_v21 = vpop.f32.mrb[19].mxu0 }
 0x14f   :  { %v728_v24 = vadd.f32 %v1463_v18, %v1873_v58  ;;  %v1466_v25 = vadd.f32 %v1465_v21, %v1464_v19  ;;  %1578 = vmatmul.mubr.bf16.gmra.mrb[20].mxu1 %v787_v20 }
 0x151   :  { %v729_v26 = vadd.f32 %v1466_v25, %v1873_v58  ;;  %v760_v27 = vmax.f32 %v728_v24, 0.0 }
 0x153   :  { %v761_v28 = vmax.f32 %v729_v26, 0.0  ;;  %v1467_v29 = vpop.f32.mrb[20].mxu0 }
 0x154   :  { %v1468_v30 = vpop.f32.mrb[21].mxu0 }
 0x155   :  { %v1469_v31 = vadd.f32 %v1468_v30, %v1467_v29  ;;  %v1470_v32 = vpop.f32.mrb[22].mxu0  ;;  %v788_v33 = vpack.c.bf16 %v761_v28, %v760_v27 }
 0x156   :  { %v1471_v34 = vpop.f32.mrb[23].mxu0 }
 0x157   :  { %v730_v35 = vadd.f32 %v1469_v31, %v1873_v58  ;;  %v1472_v36 = vadd.f32 %v1471_v34, %v1470_v32  ;;  %1581 = vmatprep.mubr.bf16.mxu1 %v788_v33 }
 0x159   :  { %v731_v37 = vadd.f32 %v1472_v36, %v1873_v58  ;;  %v762_v38 = vmax.f32 %v730_v35, 0.0 }
 0x15b   :  { %v763_v39 = vmax.f32 %v731_v37, 0.0  ;;  %v1473_v40 = vpop.f32.mrb[24].mxu0 }
 0x15c   :  { %v1474_v41 = vpop.f32.mrb[25].mxu0 }
 0x15d   :  { %v1475_v42 = vadd.f32 %v1474_v41, %v1473_v40  ;;  %v1476_v43 = vpop.f32.mrb[26].mxu0  ;;  %v789_v44 = vpack.c.bf16 %v763_v39, %v762_v38 }
 0x15e   :  { %v1477_v46 = vpop.f32.mrb[27].mxu0 }
 0x15f   :  { %v732_v47 = vadd.f32 %v1475_v42, %v1873_v58  ;;  %v1478_v48 = vadd.f32 %v1477_v46, %v1476_v43  ;;  %1582 = vmatmul.mubr.bf16.gmra.mrb[24].mxu1 %v789_v44 }
 0x161   :  { %v733_v49 = vadd.f32 %v1478_v48, %v1873_v58  ;;  %v764_v50 = vmax.f32 %v732_v47, 0.0 }
 0x163   :  { %v765_v51 = vmax.f32 %v733_v49, 0.0  ;;  %v1479_v52 = vpop.f32.mrb[28].mxu0 }
 0x164   :  { %v1480_v53 = vpop.f32.mrb[29].mxu0 }
 0x165   :  { %v1481_v54 = vadd.f32 %v1480_v53, %v1479_v52  ;;  %v1482_v55 = vpop.f32.mrb[30].mxu0  ;;  %v790_v56 = vpack.c.bf16 %v765_v51, %v764_v50 }
 0x166   :  { %v1483_v57 = vpop.f32.mrb[31].mxu0 }
 0x167   :  { %v734_v59 = vadd.f32 %v1481_v54, %v1873_v58  ;;  %v1484_v60 = vadd.f32 %v1483_v57, %v1482_v55  ;;  %1585 = vmatprep.mubr.bf16.mxu1 %v790_v56 }
 0x169   :  { %v735_v61 = vadd.f32 %v1484_v60, %v1873_v58  ;;  %v766_v62 = vmax.f32 %v734_v59, 0.0 }
 0x16b   :  { %v767_v63 = vmax.f32 %v735_v61, 0.0  ;;  %v1485_v0 = vpop.f32.mrb[32].mxu0 }
 0x16c   :  { %v1486_v1 = vpop.f32.mrb[33].mxu0 }
 0x16d   :  { %v1487_v2 = vadd.f32 %v1486_v1, %v1485_v0  ;;  %v1488_v3 = vpop.f32.mrb[34].mxu0  ;;  %v791_v5 = vpack.c.bf16 %v767_v63, %v766_v62 }
 0x16e   :  { %v1489_v6 = vpop.f32.mrb[35].mxu0 }
 0x16f   :  { %v736_v7 = vadd.f32 %v1487_v2, %v1873_v58  ;;  %v1490_v8 = vadd.f32 %v1489_v6, %v1488_v3  ;;  %1586 = vmatmul.mubr.bf16.gmra.mrb[28].mxu1 %v791_v5 }
 0x171   :  { %v737_v9 = vadd.f32 %v1490_v8, %v1873_v58  ;;  %v768_v10 = vmax.f32 %v736_v7, 0.0 }
 0x173   :  { %v769_v11 = vmax.f32 %v737_v9, 0.0  ;;  %v1491_v12 = vpop.f32.mrb[36].mxu0 }
 0x174   :  { %v1492_v13 = vpop.f32.mrb[37].mxu0 }
 0x175   :  { %v1493_v14 = vadd.f32 %v1492_v13, %v1491_v12  ;;  %v1494_v15 = vpop.f32.mrb[38].mxu0  ;;  %v792_v16 = vpack.c.bf16 %v769_v11, %v768_v10 }
 0x176   :  { %v1495_v17 = vpop.f32.mrb[39].mxu0 }
 0x177   :  { %v738_v18 = vadd.f32 %v1493_v14, %v1873_v58  ;;  %v1496_v19 = vadd.f32 %v1495_v17, %v1494_v15  ;;  %1589 = vmatprep.mubr.bf16.mxu1 %v792_v16 }
 0x179   :  { %v739_v20 = vadd.f32 %v1496_v19, %v1873_v58  ;;  %v770_v21 = vmax.f32 %v738_v18, 0.0 }
 0x17b   :  { %v771_v24 = vmax.f32 %v739_v20, 0.0  ;;  %v1497_v25 = vpop.f32.mrb[40].mxu0 }
 0x17c   :  { %v1498_v26 = vpop.f32.mrb[41].mxu0 }
 0x17d   :  { %v1499_v27 = vadd.f32 %v1498_v26, %v1497_v25  ;;  %v1500_v28 = vpop.f32.mrb[42].mxu0  ;;  %v793_v29 = vpack.c.bf16 %v771_v24, %v770_v21 }
 0x17e   :  { %v1501_v30 = vpop.f32.mrb[43].mxu0 }
 0x17f   :  { %v740_v31 = vadd.f32 %v1499_v27, %v1873_v58  ;;  %v1502_v32 = vadd.f32 %v1501_v30, %v1500_v28  ;;  %1590 = vmatmul.mubr.bf16.gmra.mrb[32].mxu1 %v793_v29 }
 0x181   :  { %v741_v33 = vadd.f32 %v1502_v32, %v1873_v58  ;;  %v772_v34 = vmax.f32 %v740_v31, 0.0 }
 0x183   :  { %v773_v35 = vmax.f32 %v741_v33, 0.0  ;;  %v1503_v36 = vpop.f32.mrb[44].mxu0 }
 0x184   :  { %v1504_v37 = vpop.f32.mrb[45].mxu0 }
 0x185   :  { %v1505_v38 = vadd.f32 %v1504_v37, %v1503_v36  ;;  %v1506_v39 = vpop.f32.mrb[46].mxu0  ;;  %v794_v40 = vpack.c.bf16 %v773_v35, %v772_v34 }
 0x186   :  { %v1507_v41 = vpop.f32.mrb[47].mxu0 }
 0x187   :  { %v742_v42 = vadd.f32 %v1505_v38, %v1873_v58  ;;  %v1508_v43 = vadd.f32 %v1507_v41, %v1506_v39  ;;  %1593 = vmatprep.mubr.bf16.mxu1 %v794_v40 }
 0x189   :  { %v743_v44 = vadd.f32 %v1508_v43, %v1873_v58  ;;  %v774_v46 = vmax.f32 %v742_v42, 0.0 }
 0x18b   :  { %v775_v47 = vmax.f32 %v743_v44, 0.0 }
 0x18d   :  { %v795_v48 = vpack.c.bf16 %v775_v47, %v774_v46 }
 0x18f   :  { %1594 = vmatmul.mubr.bf16.gmra.mrb[36].mxu1 %v795_v48 }
 0x190   :  { %1597 = vmatprep.mubr.bf16.mxu1 %v1879_v23 }
 0x197   :  { %1598 = vmatmul.mubr.bf16.gmra.mrb[40].mxu1 %v1885_v45 }
 0x198   :  { %1601 = vmatprep.mubr.bf16.mxu1 %v1891_v4 }
 0x19f   :  { %1602 = vmatmul.mubr.bf16.gmra.mrb[44].mxu1 %v1897_v22 }
 0x212   :  { %v1575_v49 = vpop.f32.mrb[16].mxu1 }
 0x213   :  { %v898_v50 = vpop.f32.mrb[17].mxu1 }
 0x214   :  { %v1576_v51 = vpop.f32.mrb[18].mxu1 }
 0x215   :  { %v1334_v52 = vpack.c.bf16 %v1576_v51, %v1575_v49  ;;  %v901_v53 = vpop.f32.mrb[19].mxu1 }
 0x216   :  { %v1329_v54 = vpack.c.bf16 %v901_v53, %v898_v50 }
 0x217   :  { %1406 = vst [vmem:[#allocation9 + $0x8] sm:$0xff] %v1334_v52  }
 0x218   :  { %1330 = vst [vmem:[#allocation9] sm:$0xff] %v1329_v54  }
 0x222   :  { %v1579_v58 = vpop.f32.mrb[20].mxu1 }
 0x223   :  { %v914_v55 = vpop.f32.mrb[21].mxu1 }
 0x224   :  { %v1580_v56 = vpop.f32.mrb[22].mxu1 }
 0x225   :  { %v1344_v57 = vpack.c.bf16 %v1580_v56, %v1579_v58  ;;  %v917_v59 = vpop.f32.mrb[23].mxu1 }
 0x226   :  { %v1339_v23 = vpack.c.bf16 %v917_v59, %v914_v55 }
 0x227   :  { %1408 = vst [vmem:[#allocation9 + $0x18] sm:$0xff] %v1344_v57  }
 0x228   :  { %1407 = vst [vmem:[#allocation9 + $0x10] sm:$0xff] %v1339_v23  }
 0x232   :  { %v1583_v45 = vpop.f32.mrb[24].mxu1 }
 0x233   :  { %v930_v4 = vpop.f32.mrb[25].mxu1 }
 0x234   :  { %v1584_v60 = vpop.f32.mrb[26].mxu1 }
 0x235   :  { %v1354_v22 = vpack.c.bf16 %v1584_v60, %v1583_v45  ;;  %v933_v61 = vpop.f32.mrb[27].mxu1 }
 0x236   :  { %v1349_v62 = vpack.c.bf16 %v933_v61, %v930_v4 }
 0x237   :  { %1410 = vst [vmem:[#allocation9 + $0x28] sm:$0xff] %v1354_v22  }
 0x238   :  { %1409 = vst [vmem:[#allocation9 + $0x20] sm:$0xff] %v1349_v62  }
 0x242   :  { %v1587_v63 = vpop.f32.mrb[28].mxu1 }
 0x243   :  { %v946_v0 = vpop.f32.mrb[29].mxu1 }
 0x244   :  { %v1588_v1 = vpop.f32.mrb[30].mxu1 }
 0x245   :  { %v1364_v2 = vpack.c.bf16 %v1588_v1, %v1587_v63  ;;  %v949_v3 = vpop.f32.mrb[31].mxu1 }
 0x246   :  { %v1359_v5 = vpack.c.bf16 %v949_v3, %v946_v0 }
 0x247   :  { %1412 = vst [vmem:[#allocation9 + $0x38] sm:$0xff] %v1364_v2  }
 0x248   :  { %1411 = vst [vmem:[#allocation9 + $0x30] sm:$0xff] %v1359_v5  }
 0x252   :  { %v1591_v6 = vpop.f32.mrb[32].mxu1 }
 0x253   :  { %v962_v7 = vpop.f32.mrb[33].mxu1 }
 0x254   :  { %v1592_v8 = vpop.f32.mrb[34].mxu1 }
 0x255   :  { %v1374_v9 = vpack.c.bf16 %v1592_v8, %v1591_v6  ;;  %v965_v10 = vpop.f32.mrb[35].mxu1 }
 0x256   :  { %v1369_v11 = vpack.c.bf16 %v965_v10, %v962_v7 }
 0x257   :  { %1414 = vst [vmem:[#allocation9 + $0x48] sm:$0xff] %v1374_v9  }
 0x258   :  { %1413 = vst [vmem:[#allocation9 + $0x40] sm:$0xff] %v1369_v11  }
 0x262   :  { %v1595_v12 = vpop.f32.mrb[36].mxu1 }
 0x263   :  { %v978_v13 = vpop.f32.mrb[37].mxu1 }
 0x264   :  { %v1596_v14 = vpop.f32.mrb[38].mxu1 }
 0x265   :  { %v1384_v15 = vpack.c.bf16 %v1596_v14, %v1595_v12  ;;  %v981_v16 = vpop.f32.mrb[39].mxu1 }
 0x266   :  { %v1379_v17 = vpack.c.bf16 %v981_v16, %v978_v13 }
 0x267   :  { %1416 = vst [vmem:[#allocation9 + $0x58] sm:$0xff] %v1384_v15  }
 0x268   :  { %1415 = vst [vmem:[#allocation9 + $0x50] sm:$0xff] %v1379_v17  }
 0x26a   :  { %v1599_v18 = vpop.f32.mrb[40].mxu1 }
 0x26b   :  { %v994_v19 = vpop.f32.mrb[41].mxu1 }
 0x26c   :  { %v1600_v20 = vpop.f32.mrb[42].mxu1 }
 0x26d   :  { %v1394_v21 = vpack.c.bf16 %v1600_v20, %v1599_v18  ;;  %v997_v24 = vpop.f32.mrb[43].mxu1 }
 0x26e   :  { %v1389_v25 = vpack.c.bf16 %v997_v24, %v994_v19 }
 0x26f   :  { %1418 = vst [vmem:[#allocation9 + $0x68] sm:$0xff] %v1394_v21  }
 0x270   :  { %1417 = vst [vmem:[#allocation9 + $0x60] sm:$0xff] %v1389_v25  }
 0x272   :  { %v1603_v26 = vpop.f32.mrb[44].mxu1 }
 0x273   :  { %v1010_v27 = vpop.f32.mrb[45].mxu1 }
 0x274   :  { %v1604_v28 = vpop.f32.mrb[46].mxu1 }
 0x275   :  { %v1404_v29 = vpack.c.bf16 %v1604_v28, %v1603_v26  ;;  %v1013_v30 = vpop.f32.mrb[47].mxu1 }
 0x276   :  { %v1399_v31 = vpack.c.bf16 %v1013_v30, %v1010_v27 }
 0x277   :  { %1420 = vst [vmem:[#allocation9 + $0x78] sm:$0xff] %v1404_v29  }
 0x278   :  { %1419 = vst [vmem:[#allocation9 + $0x70] sm:$0xff] %v1399_v31  }
 0x279   :  { %1778 = shalt.err (!%p1775_p0)
}
 0x27a   :  { %s1779_s8 = scalar_lea.hbm %s1938_s4, 2048 }
 0x27b   :  { %p1780_p1 = scmp.ne.s32.totalorder %s1938_s4, %s1779_s8  ;;  %p1783_p2 = scmp.lt.u32.totalorder %s1779_s8, %s1938_s4 }
 0x27d   :  { %p1785_p3 = pnand %p1783_p2, %p1780_p1 }
 0x27f   :  { %1788 = shalt.err (!%p1785_p3)
}
 0x280   :  { %1196 = dma.vmem_to_hbm [thread:$0]  %s1191_s30, 2048, %s1938_s4, [#allocation5], %s1796_s25, %s1796_s25, %s1797_s26  }
 0x281   :  { %1793 = dma.done.wait [#allocation5], 2048  }
 0x282   :  { %1794 = vsyncadd [#allocation5], 4294965248 }
 0x283   :  { %1200 = vsyncpa [#allocation4], 1 }
 0x284   :  { %1201 = vsyncpa [#allocation7], 1 }
 0x285   :  { %1202 = vsyncpa [#allocation5], 1 }

</bundles_post_ra>
